<compile_context>
chip_gen: v7x
topology: tpu7x:2x2x1
jax: 0.10.0
libtpu: 0.0.40
codegen_flags: <defaults>
</compile_context>

<pallas_src>
import jax
import jax.numpy as jnp
from jax.experimental import pallas as pl
from jax.experimental.pallas import tpu as pltpu

_LANE = 128
_SUBLANE = 8


def _round_up(n, m):
    return ((n + m - 1) // m) * m


def lstm_cell_kernel(xh_ref, c_ref, w_ref, b_ref, out_ref):
    """One batch tile of the LSTM cell.

    xh_ref : (TB, KP)     bf16  [x | h] concatenated along features (zero padded)
    c_ref  : (TB, HP)     f32   previous cell state (zero padded)
    w_ref  : (KP, 4*HP)   bf16  fused [W_i2h ; W_h2h]^T, gate blocks 128-aligned
    b_ref  : (1, 4*HP)    f32   b_i2h + b_h2h, gate blocks 128-aligned
    out_ref: (TB, 5*HP)   f32   [h_t | c_t | i_t | f_t | o_t], lane-dense
    """
    HP = c_ref.shape[-1]
    # single fused MXU matmul, f32 accumulation
    preact = jnp.dot(xh_ref[...], w_ref[...],
                     preferred_element_type=jnp.float32) + b_ref[...]
    # gate blocks are 128-lane aligned (module gate order along 4H: i, f, o, g)
    ifo = jax.nn.sigmoid(preact[:, :3 * HP])      # one wide EUP pass
    i_t = ifo[:, 0 * HP:1 * HP]
    f_t = ifo[:, 1 * HP:2 * HP]
    o_t = ifo[:, 2 * HP:3 * HP]
    g_t = jnp.tanh(preact[:, 3 * HP:4 * HP])
    c_t = c_ref[...] * f_t + i_t * g_t
    h_t = o_t * jnp.tanh(c_t)
    # lane-aligned, full-width (unmasked) slice stores into the lane-dense slab
    out_ref[:, 0 * HP:1 * HP] = h_t
    out_ref[:, 1 * HP:2 * HP] = c_t
    out_ref[:, 2 * HP:3 * HP] = i_t
    out_ref[:, 3 * HP:4 * HP] = f_t
    out_ref[:, 4 * HP:5 * HP] = o_t


def pack_lstm_params(w_i2h, b_i2h, w_h2h, b_h2h, *, mxu_dtype=jnp.bfloat16):
    """Pack PyTorch-layout LSTMCell params into one fused, lane-aligned matrix.

    Done once per model (not per timestep).
    w_i2h: (4H, I), w_h2h: (4H, H), biases: (4H,).  Gate order along 4H is
    [i, f, o, g] per the module's slicing convention.
    Returns (W, bias, meta):
      W    : (KP, 4*HP) mxu_dtype, KP = round_up(I+H, 128), HP = round_up(H, 128)
      bias : (1, 4*HP)  float32 (b_i2h + b_h2h)
    """
    four_h, I = w_i2h.shape
    H = w_h2h.shape[1]
    assert four_h == 4 * H and w_h2h.shape[0] == 4 * H
    HP = _round_up(H, _LANE)
    KP = _round_up(I + H, _LANE)

    W = jnp.zeros((KP, 4 * HP), jnp.float32)
    bias = jnp.zeros((1, 4 * HP), jnp.float32)
    b_sum = (b_i2h + b_h2h).astype(jnp.float32)
    for g in range(4):
        wi_g = w_i2h[g * H:(g + 1) * H, :].astype(jnp.float32).T  # (I, H)
        wh_g = w_h2h[g * H:(g + 1) * H, :].astype(jnp.float32).T  # (H, H)
        W = W.at[:I, g * HP:g * HP + H].set(wi_g)
        W = W.at[I:I + H, g * HP:g * HP + H].set(wh_g)
        bias = bias.at[0, g * HP:g * HP + H].set(b_sum[g * H:(g + 1) * H])
    return W.astype(mxu_dtype), bias, (I, H, HP, KP)


def lstm_cell_forward(x, hidden, packed_w, packed_b, meta):
    """x: (1, B, I); hidden: ((1,B,H),(1,B,H)) or None.
    Returns (h_t, c_t, i_t, f_t, o_t), each (1, B, H) float32."""
    I, H, HP, KP = meta
    B = x.shape[1]
    assert x.shape[2] == I
    if hidden is None:
        # module's _init_hidden is only well-defined when I == H; (1,B,H) zeros
        # is identical in that case.
        h = jnp.zeros((1, B, H), x.dtype)
        c = jnp.zeros((1, B, H), x.dtype)
    else:
        h, c = hidden

    # batch tiling: pipelined activation DMA, megacore-parallel on v7x
    BP = _round_up(max(B, 1), _SUBLANE)
    TB = BP if BP <= 256 else 256
    BP = _round_up(BP, TB)
    grid = (BP // TB,)

    mxu_dtype = packed_w.dtype
    x2 = x.reshape(B, I).astype(mxu_dtype)
    h2 = h.reshape(B, H).astype(mxu_dtype)
    c2 = c.reshape(B, H).astype(jnp.float32)

    # activation slab built directly in bf16 (halves wrapper-side bytes + DMA)
    xh = jnp.zeros((BP, KP), mxu_dtype)
    xh = xh.at[:B, :I].set(x2).at[:B, I:I + H].set(h2)
    c_pad = jnp.zeros((BP, HP), jnp.float32).at[:B, :H].set(c2)

    out = pl.pallas_call(
        lstm_cell_kernel,
        out_shape=jax.ShapeDtypeStruct((BP, 5 * HP), jnp.float32),
        grid=grid,
        in_specs=[
            pl.BlockSpec((TB, KP), lambda b: (b, 0)),
            pl.BlockSpec((TB, HP), lambda b: (b, 0)),
            pl.BlockSpec((KP, 4 * HP), lambda b: (0, 0)),   # weights VMEM-resident
            pl.BlockSpec((1, 4 * HP), lambda b: (0, 0)),
        ],
        out_specs=pl.BlockSpec((TB, 5 * HP), lambda b: (b, 0)),
        compiler_params=pltpu.CompilerParams(
            dimension_semantics=("parallel",)),
    )(xh, c_pad, packed_w, packed_b)

    def take(slot):
        return out[:B, slot * HP:slot * HP + H].reshape(1, B, H)

    return tuple(take(s) for s in range(5))  # (h_t, c_t, i_t, f_t, o_t)


def _reference_forward(x, hidden, w_i2h, b_i2h, w_h2h, b_h2h, H):
    # pure-JAX f32 mirror of the PyTorch module for verification
    h, c = hidden
    B = x.shape[1]
    x2 = x.reshape(B, -1)
    h2 = h.reshape(B, -1)
    c2 = c.reshape(B, -1)
    preact = x2 @ w_i2h.T + b_i2h + h2 @ w_h2h.T + b_h2h
    gates = jax.nn.sigmoid(preact[:, :3 * H])
    g_t = jnp.tanh(preact[:, 3 * H:])
    i_t = gates[:, :H]
    f_t = gates[:, H:2 * H]
    o_t = gates[:, -H:]
    c_t = c2 * f_t + i_t * g_t
    h_t = o_t * jnp.tanh(c_t)
    rs = lambda a: a.reshape(1, B, H)
    return tuple(map(rs, (h_t, c_t, i_t, f_t, o_t)))


if __name__ == "__main__":
    key = jax.random.PRNGKey(0)
    B, I, H = 6, 40, 32   # exercises batch / K / gate padding and I != H

    k_wi, k_wh, k_bi, k_bh, k_x, k_h, k_c = jax.random.split(key, 7)

    # xavier_normal_-style weights (PyTorch layout: (out_features, in_features));
    # small random biases to exercise the bias path.
    std_i = (2.0 / (I + 4 * H)) ** 0.5
    std_h = (2.0 / (H + 4 * H)) ** 0.5
    w_i2h = jax.random.normal(k_wi, (4 * H, I), jnp.float32) * std_i
    w_h2h = jax.random.normal(k_wh, (4 * H, H), jnp.float32) * std_h
    b_i2h = jax.random.normal(k_bi, (4 * H,), jnp.float32) * 0.1
    b_h2h = jax.random.normal(k_bh, (4 * H,), jnp.float32) * 0.1

    x = jax.random.normal(k_x, (1, B, I), jnp.float32)
    h0 = jax.random.normal(k_h, (1, B, H), jnp.float32)
    c0 = jax.random.normal(k_c, (1, B, H), jnp.float32)

    packed_w, packed_b, meta = pack_lstm_params(w_i2h, b_i2h, w_h2h, b_h2h)
    outs = lstm_cell_forward(x, (h0, c0), packed_w, packed_b, meta)
    outs = jax.block_until_ready(outs)

    refs = _reference_forward(x, (h0, c0), w_i2h, b_i2h, w_h2h, b_h2h, H)
    # bf16 MXU operands (f32 accumulation) => ~1e-2 max abs error vs f32 ref
    for o, r in zip(outs, refs):
        assert o.shape == r.shape
        err = float(jnp.max(jnp.abs(o - r)))
        assert err < 5e-2, err

    # also exercise the hidden=None branch semantics (zeros state)
    outs0 = lstm_cell_forward(x[:, :, :I], None, packed_w, packed_b, meta) \
        if I == H else None

    print("KERNEL_OK")
</pallas_src>

<mosaic_0001>
module attributes {stable_mosaic.version = 11 : i64} {
  func.func @lstm_cell_kernel(%arg0: i32, %arg1: memref<8x128xbf16, #tpu.memory_space<vmem>>, %arg2: memref<8x128xf32, #tpu.memory_space<vmem>>, %arg3: memref<128x512xbf16, #tpu.memory_space<vmem>>, %arg4: memref<1x512xf32, #tpu.memory_space<vmem>>, %arg5: memref<8x640xf32, #tpu.memory_space<vmem>>) attributes {dimension_semantics = [#tpu.dimension_semantics<parallel>], iteration_bounds = array<i64: 1>, scalar_prefetch = 0 : i64, scratch_operands = 0 : i64, tpu.core_type = #tpu.core_type<tc>, window_params = [{transform_indices = @transform_0, window_bounds = array<i64: 8, 128>}, {transform_indices = @transform_1, window_bounds = array<i64: 8, 128>}, {pipeline_mode = #tpu.pipeline_mode<synchronous>, transform_indices = @transform_2, window_bounds = array<i64: 128, 512>}, {pipeline_mode = #tpu.pipeline_mode<synchronous>, transform_indices = @transform_3, window_bounds = array<i64: 1, 512>}, {transform_indices = @transform_4, window_bounds = array<i64: 8, 640>}]} {
    %c0 = arith.constant 0 : index
    %c0_0 = arith.constant 0 : index
    %0 = vector.load %arg1[%c0, %c0_0] : memref<8x128xbf16, #tpu.memory_space<vmem>>, vector<8x128xbf16>
    %c0_1 = arith.constant 0 : index
    %c0_2 = arith.constant 0 : index
    %1 = vector.load %arg3[%c0_1, %c0_2] : memref<128x512xbf16, #tpu.memory_space<vmem>>, vector<128x512xbf16>
    %cst = arith.constant dense<0.000000e+00> : vector<8x512xf32>
    %2 = tpu.matmul %0, %1, %cst {dimension_numbers = #tpu.dot_dimension_numbers<[1], [0], [0], [1], [0, 0, 1, 1], [], []>} : vector<8x128xbf16>, vector<128x512xbf16>, vector<8x512xf32> -> vector<8x512xf32>
    %c0_3 = arith.constant 0 : index
    %c0_4 = arith.constant 0 : index
    %3 = vector.load %arg4[%c0_3, %c0_4] : memref<1x512xf32, #tpu.memory_space<vmem>>, vector<1x512xf32>
    %4 = vector.broadcast %3 : vector<1x512xf32> to vector<8x512xf32>
    %5 = arith.addf %2, %4 : vector<8x512xf32>
    %6 = vector.extract_strided_slice %5 {offsets = [0, 0], sizes = [8, 384], strides = [1, 1]} : vector<8x512xf32> to vector<8x384xf32>
    %7 = arith.negf %6 : vector<8x384xf32>
    %8 = math.exp %7 : vector<8x384xf32>
    %cst_5 = arith.constant 1.000000e+00 : f32
    %9 = vector.broadcast %cst_5 : f32 to vector<8x384xf32>
    %10 = arith.addf %9, %8 : vector<8x384xf32>
    %11 = arith.divf %9, %10 : vector<8x384xf32>
    %12 = vector.extract_strided_slice %11 {offsets = [0, 0], sizes = [8, 128], strides = [1, 1]} : vector<8x384xf32> to vector<8x128xf32>
    %13 = vector.extract_strided_slice %11 {offsets = [0, 128], sizes = [8, 128], strides = [1, 1]} : vector<8x384xf32> to vector<8x128xf32>
    %14 = vector.extract_strided_slice %11 {offsets = [0, 256], sizes = [8, 128], strides = [1, 1]} : vector<8x384xf32> to vector<8x128xf32>
    %15 = vector.extract_strided_slice %5 {offsets = [0, 384], sizes = [8, 128], strides = [1, 1]} : vector<8x512xf32> to vector<8x128xf32>
    %16 = math.tanh %15 : vector<8x128xf32>
    %c0_6 = arith.constant 0 : index
    %c0_7 = arith.constant 0 : index
    %17 = vector.load %arg2[%c0_6, %c0_7] : memref<8x128xf32, #tpu.memory_space<vmem>>, vector<8x128xf32>
    %18 = arith.mulf %17, %13 : vector<8x128xf32>
    %19 = arith.mulf %12, %16 : vector<8x128xf32>
    %20 = arith.addf %18, %19 : vector<8x128xf32>
    %21 = math.tanh %20 : vector<8x128xf32>
    %22 = arith.mulf %14, %21 : vector<8x128xf32>
    %c0_8 = arith.constant 0 : index
    %c0_9 = arith.constant 0 : index
    %23 = vector.load %arg5[%c0_8, %c0_9] : memref<8x640xf32, #tpu.memory_space<vmem>>, vector<8x128xf32>
    tpu.vector_store %arg5[%c0_8, %c0_9], %22 {strides = array<i32>} : memref<8x640xf32, #tpu.memory_space<vmem>>, vector<8x128xf32>,
    %c0_10 = arith.constant 0 : index
    %c128 = arith.constant 128 : index
    %24 = vector.load %arg5[%c0_10, %c128] : memref<8x640xf32, #tpu.memory_space<vmem>>, vector<8x128xf32>
    tpu.vector_store %arg5[%c0_10, %c128], %20 {strides = array<i32>} : memref<8x640xf32, #tpu.memory_space<vmem>>, vector<8x128xf32>,
    %c0_11 = arith.constant 0 : index
    %c256 = arith.constant 256 : index
    %25 = vector.load %arg5[%c0_11, %c256] : memref<8x640xf32, #tpu.memory_space<vmem>>, vector<8x128xf32>
    tpu.vector_store %arg5[%c0_11, %c256], %12 {strides = array<i32>} : memref<8x640xf32, #tpu.memory_space<vmem>>, vector<8x128xf32>,
    %c0_12 = arith.constant 0 : index
    %c384 = arith.constant 384 : index
    %26 = vector.load %arg5[%c0_12, %c384] : memref<8x640xf32, #tpu.memory_space<vmem>>, vector<8x128xf32>
    tpu.vector_store %arg5[%c0_12, %c384], %13 {strides = array<i32>} : memref<8x640xf32, #tpu.memory_space<vmem>>, vector<8x128xf32>,
    %c0_13 = arith.constant 0 : index
    %c512 = arith.constant 512 : index
    %27 = vector.load %arg5[%c0_13, %c512] : memref<8x640xf32, #tpu.memory_space<vmem>>, vector<8x128xf32>
    tpu.vector_store %arg5[%c0_13, %c512], %14 {strides = array<i32>} : memref<8x640xf32, #tpu.memory_space<vmem>>, vector<8x128xf32>,
    return
  }
  func.func @transform_0(%arg0: i32) -> (i32, i32) {
    %c0_i32 = arith.constant 0 : i32
    %c0_i32_0 = arith.constant 0 : i32
    return %arg0, %c0_i32 : i32, i32
  }
  func.func @transform_1(%arg0: i32) -> (i32, i32) {
    %c0_i32 = arith.constant 0 : i32
    %c0_i32_0 = arith.constant 0 : i32
    return %arg0, %c0_i32 : i32, i32
  }
  func.func @transform_2(%arg0: i32) -> (i32, i32) {
    %c0_i32 = arith.constant 0 : i32
    %c0_i32_0 = arith.constant 0 : i32
    %c0_i32_1 = arith.constant 0 : i32
    return %c0_i32, %c0_i32_0 : i32, i32
  }
  func.func @transform_3(%arg0: i32) -> (i32, i32) {
    %c0_i32 = arith.constant 0 : i32
    %c0_i32_0 = arith.constant 0 : i32
    %c0_i32_1 = arith.constant 0 : i32
    return %c0_i32, %c0_i32_0 : i32, i32
  }
  func.func @transform_4(%arg0: i32) -> (i32, i32) {
    %c0_i32 = arith.constant 0 : i32
    %c0_i32_0 = arith.constant 0 : i32
    return %arg0, %c0_i32 : i32, i32
  }
}

</mosaic_0001>

<bundles_post_ra>
// kernel: tpu_custom_call.1
= control target key start
LH: loop header
LB: loop body
LE: loop exit
PB: predicated region body
PF: predicated region fallthrough
CT: control target
= control target key end

     0   :  { %9 = vsyncpa [#allocation3], 0  ;;  %s682_s0 = inlined_call_operand.hbm [shape: bf16[8,128], index: 0, kind: input, shape index: {}]   ;;  %s683_s1 = inlined_call_operand.hbm [shape: f32[8,128], index: 1, kind: input, shape index: {}]   ;;  %s684_s2 = inlined_call_operand.hbm [shape: bf16[128,512], index: 2, kind: input, shape index: {}]   ;;  %s685_s3 = inlined_call_operand.vmem [shape: f32[1,512], index: 3, kind: input, shape index: {}]   ;;  %s686_s4 = inlined_call_operand.hbm [shape: f32[8,640], index: 4, kind: output, shape index: {}]  }
   0x1   :  { %10 = vsyncpa [#allocation6], 0 }
   0x2   :  { %11 = vsyncpa [#allocation4], 0  ;;  %s599_s15 = smov [#allocation5]   ;;  %s600_s17 = smov [#allocation2]  }
   0x3   :  { %s28_s16 = sshll.u32 %s599_s15, 4  ;;  %s18_s18 = sshll.u32 %s600_s17, 4  ;;  %s29_s16 = int_to_ptr.vmem [resolvable:$true] %s28_s16  ;;  %s19_s18 = int_to_ptr.vmem [resolvable:$true] %s18_s18 }
   0x4   :  { %s505_s21 = scalar_lea.hbm %s683_s1, 128 }
   0x5   :  { %p506_p0 = scmp.ne.s32.totalorder %s683_s1, %s505_s21  ;;  %p509_p1 = scmp.lt.u32.totalorder %s505_s21, %s683_s1 }
   0x7   :  { %p511_p2 = pnand %p509_p1, %p506_p0 }
   0x9   :  { %514 = shalt.err (!%p511_p2)
}
   0xa   :  { %s515_s26 = scalar_lea.vmem %s29_s16, 128  ;;  %p520_p4 = scmp.lt.s32.totalorder %s29_s16, %s29_s16 }
   0xb   :  { %p516_p3 = scmp.ne.s32.totalorder %s29_s16, %s515_s26  ;;  %p521_p5 = scmp.lt.s32.totalorder %s515_s26, %s515_s26 }
   0xd   :  { %p522_p6 = por %p521_p5, %p520_p4 }
   0xf   :  { %p523_p7 = pnand %p522_p6, %p516_p3 }
  0x11   :  { %526 = shalt.err (!%p523_p7)
}
  0x12   :  { %31 = dma.hbm_to_vmem [thread:$0]  %s683_s1, 128, %s29_s16, [#allocation6]  }
  0x13   :  { %s527_s5 = scalar_lea.hbm %s682_s0, 64 }
  0x14   :  { %p528_p8 = scmp.ne.s32.totalorder %s682_s0, %s527_s5  ;;  %p531_p9 = scmp.lt.u32.totalorder %s527_s5, %s682_s0 }
  0x16   :  { %p533_p10 = pnand %p531_p9, %p528_p8 }
  0x18   :  { %536 = shalt.err (!%p533_p10)
}
  0x19   :  { %s537_s10 = scalar_lea.vmem %s19_s18, 64  ;;  %p542_p12 = scmp.lt.s32.totalorder %s19_s18, %s19_s18 }
  0x1a   :  { %p538_p11 = scmp.ne.s32.totalorder %s19_s18, %s537_s10  ;;  %p543_p13 = scmp.lt.s32.totalorder %s537_s10, %s537_s10 }
  0x1c   :  { %p544_p0 = por %p543_p13, %p542_p12 }
  0x1e   :  { %p545_p1 = pnand %p544_p0, %p538_p11 }
  0x20   :  { %548 = shalt.err (!%p545_p1)
}
  0x21   :  { %21 = dma.hbm_to_vmem [thread:$0]  %s682_s0, 64, %s19_s18, [#allocation3]  }
  0x22   :  { %s601_s12 = smov [#allocation7]   ;;  %s549_s16 = scalar_lea.hbm %s684_s2, 4096 }
  0x23   :  { %s37_s13 = sshll.u32 %s601_s12, 4  ;;  %p550_p2 = scmp.ne.s32.totalorder %s684_s2, %s549_s16  ;;  %s38_s13 = int_to_ptr.vmem [resolvable:$true] %s37_s13 }
  0x24   :  { %p553_p3 = scmp.lt.u32.totalorder %s549_s16, %s684_s2 }
  0x26   :  { %p555_p4 = pnand %p553_p3, %p550_p2 }
  0x28   :  { %558 = shalt.err (!%p555_p4)
}
  0x29   :  { %s559_s22 = scalar_lea.vmem %s38_s13, 4096  ;;  %p564_p6 = scmp.lt.s32.totalorder %s38_s13, %s38_s13 }
  0x2a   :  { %p560_p5 = scmp.ne.s32.totalorder %s38_s13, %s559_s22  ;;  %p565_p7 = scmp.lt.s32.totalorder %s559_s22, %s559_s22 }
  0x2c   :  { %p566_p8 = por %p565_p7, %p564_p6 }
  0x2e   :  { %p567_p9 = pnand %p566_p8, %p560_p5 }
  0x30   :  { %570 = shalt.err (!%p567_p9)
}
  0x31   :  { %s602_s0 = smov 256   ;;  %s603_s18 = smov 16  }
  0x32   :  { %43 = dma.hbm_to_vmem [thread:$0]  %s684_s2, 4096, %s38_s13, [#allocation6], %s602_s0, %s602_s0, %s603_s18  }
  0x33   :  { %593 = dma.done.wait [#allocation3], 64  }
  0x34   :  { %594 = vsyncadd [#allocation3], 4294967232 }
  0x35   :  { %595 = dma.done.wait [#allocation6], 4224  }
  0x36   :  { %596 = vsyncadd [#allocation6], 4294963072  ;;  %v604_v0 = vmov 0   ;;  %v441_v1 = vld [vmem:[#allocation7 + $0x4] ss:$16 sps:$4 sm:$0xff]   ;;  %v91_v34 = vlaneseq }
  0x37   :  { %303 = vmatprep.mubr.bf16.mxu0 %v604_v0  ;;  %344 = vmatprep.mubr.bf16.mxu1 %v604_v0  ;;  %v443_v2 = vld [vmem:[#allocation7] ss:$16 sps:$4 sm:$0xff]   ;;  %v444_v3 = vld [vmem:[#allocation7 + $0x24] ss:$16 sps:$4 sm:$0xff]   ;;  %v452_v6 = vld [vmem:[#allocation7 + $0xc] ss:$16 sps:$4 sm:$0xff]  }
  0x38   :  { %271 = vmatprep.subr.bf16.mxu0 %v441_v1  ;;  %v446_v4 = vld [vmem:[#allocation7 + $0x20] ss:$16 sps:$4 sm:$0xff]   ;;  %v447_v5 = vld [vmem:[#allocation7 + $0x44] ss:$16 sps:$4 sm:$0xff]   ;;  %v455_v7 = vld [vmem:[#allocation7 + $0x8] ss:$16 sps:$4 sm:$0xff]   ;;  %312 = vmatprep.subr.bf16.mxu1 %v452_v6 }
  0x39   :  { %272 = vmatpush1.bf16.msra.mxu0 %v443_v2  ;;  %v449_v8 = vld [vmem:[#allocation7 + $0x40] ss:$16 sps:$4 sm:$0xff]   ;;  %v450_v9 = vld [vmem:[#allocation7 + $0x64] ss:$16 sps:$4 sm:$0xff]   ;;  %313 = vmatpush1.bf16.msra.mxu1 %v455_v7  ;;  %v458_v10 = vld [vmem:[#allocation7 + $0x2c] ss:$16 sps:$4 sm:$0xff]  }
  0x3a   :  { %273 = vmatprep.subr.bf16.mxu0 %v444_v3  ;;  %v461_v11 = vld [vmem:[#allocation7 + $0x28] ss:$16 sps:$4 sm:$0xff]   ;;  %314 = vmatprep.subr.bf16.mxu1 %v458_v10  ;;  %v454_v12 = vld [vmem:[#allocation7 + $0x60] ss:$16 sps:$4 sm:$0xff]   ;;  %v456_v13 = vld [vmem:[#allocation7 + $0x84] ss:$16 sps:$4 sm:$0xff]  }
  0x3b   :  { %v464_v14 = vld [vmem:[#allocation7 + $0x4c] ss:$16 sps:$4 sm:$0xff]   ;;  %v467_v15 = vld [vmem:[#allocation7 + $0x48] ss:$16 sps:$4 sm:$0xff]   ;;  %v460_v17 = vld [vmem:[#allocation7 + $0x80] ss:$16 sps:$4 sm:$0xff]  }
  0x3c   :  { %v470_v16 = vld [vmem:[#allocation7 + $0x6c] ss:$16 sps:$4 sm:$0xff]   ;;  %v462_v18 = vld [vmem:[#allocation7 + $0xa4] ss:$16 sps:$4 sm:$0xff]   ;;  %v473_v19 = vld [vmem:[#allocation7 + $0x68] ss:$16 sps:$4 sm:$0xff]  }
  0x3d   :  { %274 = vmatpush1.bf16.msra.mxu0 %v446_v4  ;;  %315 = vmatpush1.bf16.msra.mxu1 %v461_v11  ;;  %v476_v20 = vld [vmem:[#allocation7 + $0x8c] ss:$16 sps:$4 sm:$0xff]   ;;  %v466_v21 = vld [vmem:[#allocation7 + $0xa0] ss:$16 sps:$4 sm:$0xff]   ;;  %v468_v22 = vld [vmem:[#allocation7 + $0xc4] ss:$16 sps:$4 sm:$0xff]  }
  0x3e   :  { %275 = vmatprep.subr.bf16.mxu0 %v447_v5  ;;  %316 = vmatprep.subr.bf16.mxu1 %v464_v14  ;;  %v479_v23 = vld [vmem:[#allocation7 + $0x88] ss:$16 sps:$4 sm:$0xff]   ;;  %v480_v24 = vld [vmem:[#allocation7 + $0xac] ss:$16 sps:$4 sm:$0xff]   ;;  %v472_v25 = vld [vmem:[#allocation7 + $0xc0] ss:$16 sps:$4 sm:$0xff]  }
  0x3f   :  { %v474_v26 = vld [vmem:[#allocation7 + $0xe4] ss:$16 sps:$4 sm:$0xff]   ;;  %v482_v27 = vld [vmem:[#allocation7 + $0xa8] ss:$16 sps:$4 sm:$0xff]   ;;  %v483_v28 = vld [vmem:[#allocation7 + $0xcc] ss:$16 sps:$4 sm:$0xff]  }
  0x40   :  { %v478_v29 = vld [vmem:[#allocation7 + $0xe0] ss:$16 sps:$4 sm:$0xff]   ;;  %v485_v30 = vld [vmem:[#allocation7 + $0xc8] ss:$16 sps:$4 sm:$0xff]   ;;  %v486_v31 = vld [vmem:[#allocation7 + $0xec] ss:$16 sps:$4 sm:$0xff]  }
  0x41   :  { %276 = vmatpush1.bf16.msra.mxu0 %v449_v8  ;;  %317 = vmatpush1.bf16.msra.mxu1 %v467_v15  ;;  %v56_v32 = vld [vmem:[#allocation2] sm:$0xf]  ;;  %v488_v33 = vld [vmem:[#allocation7 + $0xe8] ss:$16 sps:$4 sm:$0xff]   ;;  %v92_v35 = vshrl.u32 %v91_v34, 7 }
  0x42   :  { %277 = vmatprep.subr.bf16.mxu0 %v450_v9  ;;  %318 = vmatprep.subr.bf16.mxu1 %v470_v16  ;;  %v89_v37 = vld [vmem:[%s685_s3] sm:$0xf]  ;;  %v372_v3 = vld [vmem:[#allocation5] sm:$0xff]  ;;  %s605_s3 = smov [#allocation8]  }
  0x43   :  { %v93_v36 = vsub.s32 0, %v92_v35  ;;  %v97_v38 = vsub.s32 1, %v92_v35  ;;  %v101_v41 = vsub.s32 2, %v92_v35  ;;  %v105_v51 = vsub.s32 3, %v92_v35  ;;  %s389_s26 = sshll.u32 %s605_s3, 4  ;;  %s390_s26 = int_to_ptr.vmem [resolvable:$true] %s389_s26 }
  0x44   :  { %s571_s27 = scalar_lea.vmem %s390_s26, 640  ;;  %p576_p11 = scmp.lt.s32.totalorder %s390_s26, %s390_s26 }
  0x45   :  { %278 = vmatpush1.bf16.msra.mxu0 %v454_v12  ;;  %319 = vmatpush1.bf16.msra.mxu1 %v473_v19  ;;  %v94_v39 = vrot.slane %v89_v37, %v93_v36  ;;  %v98_v40 = vrot.slane %v89_v37, %v97_v38  ;;  %v102_v47 = vrot.slane %v89_v37, %v101_v41  ;;  %p572_p10 = scmp.ne.s32.totalorder %s390_s26, %s571_s27  ;;  %p577_p12 = scmp.lt.s32.totalorder %s571_s27, %s571_s27 }
  0x46   :  { %279 = vmatprep.subr.bf16.mxu0 %v456_v13  ;;  %320 = vmatprep.subr.bf16.mxu1 %v476_v20  ;;  %v106_v57 = vrot.slane %v89_v37, %v105_v51 }
  0x47   :  { %p578_p13 = por %p577_p12, %p576_p11 }
  0x49   :  { %280 = vmatpush1.bf16.msra.mxu0 %v460_v17  ;;  %321 = vmatpush1.bf16.msra.mxu1 %v479_v23  ;;  %p579_p0 = pnand %p578_p13, %p572_p10 }
  0x4a   :  { %281 = vmatprep.subr.bf16.mxu0 %v462_v18  ;;  %322 = vmatprep.subr.bf16.mxu1 %v480_v24 }
  0x4d   :  { %282 = vmatpush1.bf16.msra.mxu0 %v466_v21  ;;  %323 = vmatpush1.bf16.msra.mxu1 %v482_v27 }
  0x4e   :  { %283 = vmatprep.subr.bf16.mxu0 %v468_v22  ;;  %324 = vmatprep.subr.bf16.mxu1 %v483_v28 }
  0x51   :  { %284 = vmatpush1.bf16.msra.mxu0 %v472_v25  ;;  %325 = vmatpush1.bf16.msra.mxu1 %v485_v30 }
  0x52   :  { %285 = vmatprep.subr.bf16.mxu0 %v474_v26  ;;  %326 = vmatprep.subr.bf16.mxu1 %v486_v31 }
  0x55   :  { %286 = vmatpush1.bf16.msra.mxu0 %v478_v29  ;;  %327 = vmatpush1.bf16.msra.mxu1 %v488_v33 }
  0x58   :  { %304 = vmatmul.mubr.bf16.vlgmr.msra.gmra.mrb[0].mxu0 %v56_v32  ;;  %345 = vmatmul.mubr.bf16.vlgmr.msra.gmra.mrb[0].mxu1 %v56_v32 }
 0x12b   :  { %v305_v42 = vpop.f32.mrb[0].mxu0  ;;  %v346_v52 = vpop.f32.mrb[0].mxu1 }
 0x12c   :  { %v306_v43 = vadd.f32 %v305_v42, %v94_v39  ;;  %v307_v44 = vpop.f32.mrb[1].mxu0  ;;  %v347_v53 = vadd.f32 %v346_v52, %v102_v47  ;;  %v348_v54 = vpop.f32.mrb[1].mxu1 }
 0x12d   :  { %v308_v45 = vadd.f32 %v307_v44, %v98_v40  ;;  %v309_v46 = vpop.f32.mrb[2].mxu0  ;;  %v350_v55 = vpop.f32.mrb[2].mxu1  ;;  %v349_v59 = vadd.f32 %v348_v54, %v106_v57 }
 0x12e   :  { %v431_v48 = vmul.f32 -1.442695, %v306_v43  ;;  %v310_v49 = vpop.f32.mrb[3].mxu0  ;;  %v433_v56 = vmul.f32 -1.442695, %v347_v53  ;;  %v351_v58 = vpop.f32.mrb[3].mxu1 }
 0x12f   :  { %v432_v50 = vmul.f32 -1.442695, %v308_v45 }
 0x130   :  { %489 = vpow2.f32 %v431_v48 }
 0x131   :  { %491 = vpow2.f32 %v432_v50 }
 0x132   :  { %493 = vpow2.f32 %v433_v56 }
 0x133   :  { %495 = vtanh.f32 %v349_v59 }
 0x13a   :  { %v490_v60 = vpop.eup %489 }
 0x13b   :  { %v492_v61 = vpop.eup %491  ;;  %v362_v62 = vadd.f32 1.0, %v490_v60 }
 0x13c   :  { %v363_v63 = vadd.f32 1.0, %v492_v61  ;;  %v494_v0 = vpop.eup %493 }
 0x13d   :  { %497 = vrcp.f32 %v362_v62  ;;  %v364_v1 = vadd.f32 1.0, %v494_v0  ;;  %v496_v2 = vpop.eup %495 }
 0x13e   :  { %499 = vrcp.f32 %v363_v63 }
 0x13f   :  { %501 = vrcp.f32 %v364_v1 }
 0x147   :  { %v498_v4 = vpop.eup %497 }
 0x148   :  { %v500_v5 = vpop.eup %499  ;;  %380 = vst [vmem:[#allocation8 + $0x10] sm:$0xff] %v498_v4  ;;  %v374_v6 = vmul.f32 %v498_v4, %v496_v2 }
 0x149   :  { %381 = vst [vmem:[#allocation8 + $0x18] sm:$0xff] %v500_v5  ;;  %v373_v7 = vmul.f32 %v500_v5, %v372_v3  ;;  %v502_v9 = vpop.eup %501 }
 0x14a   :  { %382 = vst [vmem:[#allocation8 + $0x20] sm:$0xff] %v502_v9 }
 0x14b   :  { %v375_v8 = vadd.f32 %v374_v6, %v373_v7 }
 0x14d   :  { %503 = vtanh.f32 %v375_v8  ;;  %379 = vst [vmem:[#allocation8 + $0x8] sm:$0xff] %v375_v8 }
 0x157   :  { %v504_v10 = vpop.eup %503 }
 0x158   :  { %v377_v11 = vmul.f32 %v504_v10, %v502_v9 }
 0x15a   :  { %378 = vst [vmem:[#allocation8] sm:$0xff] %v377_v11 }
 0x15b   :  { %582 = shalt.err (!%p579_p0)
}
 0x15c   :  { %s583_s30 = scalar_lea.hbm %s686_s4, 640 }
 0x15d   :  { %p584_p1 = scmp.ne.s32.totalorder %s686_s4, %s583_s30  ;;  %p587_p2 = scmp.lt.u32.totalorder %s583_s30, %s686_s4 }
 0x15f   :  { %p589_p3 = pnand %p587_p2, %p584_p1 }
 0x161   :  { %592 = shalt.err (!%p589_p3)
}
 0x162   :  { %392 = dma.vmem_to_hbm [thread:$0]  %s390_s26, 640, %s686_s4, [#allocation4]  }
 0x163   :  { %597 = dma.done.wait [#allocation4], 640  }
 0x164   :  { %598 = vsyncadd [#allocation4], 4294966656 }
 0x165   :  { %396 = vsyncpa [#allocation3], 1 }
 0x166   :  { %397 = vsyncpa [#allocation6], 1 }
 0x167   :  { %398 = vsyncpa [#allocation4], 1 }

</bundles_post_ra>
